<compile_context>
chip_gen: v7x
topology: tpu7x:2x2x1
jax: 0.10.0
libtpu: 0.0.40
codegen_flags: <defaults>
</compile_context>

<pallas_src>
import numpy as np
import jax
import jax.numpy as jnp
from jax.experimental import pallas as pl
from jax.experimental.pallas import tpu as pltpu


# ----------------------------- Pallas kernel ------------------------------ #

def ppm_fused_kernel(xa_ref, qt_ref, w_ref, mask_ref, rt_ref, out_ref):
    c_in = xa_ref.shape[1] - 1            # last input channel is the ones row
    x_aug = xa_ref[0]                     # (C_in+1, HW), lane-dense

    # 1) all-scale adaptive average pool in one MXU contraction.
    #    The ones row pools to ones (each pool row sums to 1) -> bias carrier.
    pooled = jnp.dot(x_aug, qt_ref[...],
                     preferred_element_type=jnp.float32)        # (C_in+1, SS)

    # 2) all-scale 1x1 conv with folded BatchNorm (scale in W, shift via ones
    #    column), then ReLU.  Cross-scale (off-block-diagonal) entries are
    #    garbage and are masked out before the upsample matmul.
    y = jnp.dot(w_ref[...], pooled,
                preferred_element_type=jnp.float32)             # (K*C_out, SS)
    z = jnp.maximum(y, 0.0) * mask_ref[...]

    # 3) all-scale bilinear upsample (align_corners=True) in one contraction.
    branch = jnp.dot(z, rt_ref[...],
                     preferred_element_type=jnp.float32)        # (K*C_out, HW)

    # 4) fused channel concat: passthrough x then all branch outputs.
    out_ref[0, :c_in, :] = x_aug[:c_in, :]
    out_ref[0, c_in:, :] = branch


def ppm_pallas(x_aug, Qt_all, W_stack, mask, R_all, c_total):
    N, C_in1, HW = x_aug.shape
    SS = Qt_all.shape[1]
    KCo = W_stack.shape[0]
    return pl.pallas_call(
        ppm_fused_kernel,
        out_shape=jax.ShapeDtypeStruct((N, c_total, HW), jnp.float32),
        grid_spec=pltpu.PrefetchScalarGridSpec(
            num_scalar_prefetch=0,
            grid=(N,),
            in_specs=[
                pl.BlockSpec((1, C_in1, HW),   lambda n: (n, 0, 0)),
                pl.BlockSpec((HW, SS),         lambda n: (0, 0)),
                pl.BlockSpec((KCo, C_in1),     lambda n: (0, 0)),
                pl.BlockSpec((KCo, SS),        lambda n: (0, 0)),
                pl.BlockSpec((SS, HW),         lambda n: (0, 0)),
            ],
            out_specs=pl.BlockSpec((1, c_total, HW), lambda n: (n, 0, 0)),
        ),
        compiler_params=pltpu.CompilerParams(
            dimension_semantics=("parallel",)),   # v7x: one batch item per TC
    )(x_aug, Qt_all, W_stack, mask, R_all)


# ------------------------- static matrix builders -------------------------- #

def adaptive_pool_matrix(in_size, out_size):
    """P[i, j] = 1/bin_len for j in the i-th adaptive-avg-pool bin."""
    P = np.zeros((out_size, in_size), dtype=np.float32)
    for i in range(out_size):
        start = (i * in_size) // out_size
        end = -((-(i + 1) * in_size) // out_size)  # ceil((i+1)*in/out)
        P[i, start:end] = 1.0 / (end - start)
    return P


def bilinear_upsample_matrix(out_size, in_size):
    """U[i, a]: weight of input sample a for output pixel i (align_corners=True)."""
    U = np.zeros((out_size, in_size), dtype=np.float32)
    if in_size == 1:
        U[:, 0] = 1.0
        return U
    scale = (in_size - 1) / (out_size - 1)
    for i in range(out_size):
        src = i * scale
        i0 = min(int(np.floor(src)), in_size - 1)
        i1 = min(i0 + 1, in_size - 1)
        frac = src - i0
        U[i, i0] += 1.0 - frac
        U[i, i1] += frac
    return U


# ------------------------------ PPM wrapper -------------------------------- #

def make_ppm_params(key, in_ch, out_ch, out_scale, eps=1e-5):
    """Deterministic synthetic params; BN folded into per-channel scale/shift."""
    params = []
    for _ in out_scale:
        key, k_w, k_g, k_b, k_m, k_v = jax.random.split(key, 6)
        Wc = jax.random.normal(k_w, (out_ch, in_ch), jnp.float32) * 0.2
        gamma = jax.random.uniform(k_g, (out_ch,), jnp.float32, 0.5, 1.5)
        beta = jax.random.normal(k_b, (out_ch,), jnp.float32) * 0.1
        run_mean = jax.random.normal(k_m, (out_ch,), jnp.float32) * 0.1
        run_var = jax.random.uniform(k_v, (out_ch,), jnp.float32, 0.5, 1.5)
        bn_scale = gamma / jnp.sqrt(run_var + eps)
        bn_shift = beta - run_mean * bn_scale
        params.append((Wc,
                       bn_scale.reshape(out_ch, 1),
                       bn_shift.reshape(out_ch, 1)))
    return params


def ppm_forward(x, params, out_scale):
    """x: (N, C_in, H, W) NCHW. Returns (N, C_in + len(out_scale)*C_out, H, W)."""
    N, C_in, H, W = x.shape
    HW = H * W
    C_out = params[0][0].shape[0]
    K = len(out_scale)

    # ---- static fused operator matrices (numpy glue, no runtime FLOPs) ----
    Qt_blocks, Rt_blocks, W_rows = [], [], []
    for s, (Wc, bn_scale, bn_shift) in zip(out_scale, params):
        P = np.kron(adaptive_pool_matrix(H, s),
                    adaptive_pool_matrix(W, s))                  # (s*s, HW)
        U = np.kron(bilinear_upsample_matrix(H, s),
                    bilinear_upsample_matrix(W, s))              # (HW, s*s)
        Qt_blocks.append(P.T.astype(np.float32))                 # (HW, s*s)
        Rt_blocks.append(U.T.astype(np.float32))                 # (s*s, HW)
        Wc_np = np.asarray(Wc, np.float32)
        sc = np.asarray(bn_scale, np.float32).reshape(-1, 1)
        sh = np.asarray(bn_shift, np.float32).reshape(-1, 1)
        # BN scale folded into conv weight, BN shift as extra bias column.
        W_rows.append(np.concatenate([sc * Wc_np, sh], axis=1))  # (C_out, C_in+1)

    Qt_all = jnp.asarray(np.concatenate(Qt_blocks, axis=1))      # (HW, SS)
    R_all = jnp.asarray(np.concatenate(Rt_blocks, axis=0))       # (SS, HW)
    W_stack = jnp.asarray(np.concatenate(W_rows, axis=0))        # (K*C_out, C_in+1)

    SS = Qt_all.shape[1]
    mask_np = np.zeros((K * C_out, SS), np.float32)
    off = 0
    for k, s in enumerate(out_scale):
        mask_np[k * C_out:(k + 1) * C_out, off:off + s * s] = 1.0
        off += s * s
    mask = jnp.asarray(mask_np)

    # ---- augmented input: ones channel carries the folded-BN bias ---------
    xf = x.reshape(N, C_in, HW)
    x_aug = jnp.concatenate([xf, jnp.ones((N, 1, HW), x.dtype)], axis=1)

    c_total = C_in + K * C_out
    out_flat = ppm_pallas(x_aug, Qt_all, W_stack, mask, R_all, c_total)
    return out_flat.reshape(N, c_total, H, W)


def ppm_reference(x, params, out_scale):
    """Pure-JAX reference (same math, separable per-scale form)."""
    outs = [x]
    N, C_in, H, W = x.shape
    for s, (Wc, bn_scale, bn_shift) in zip(out_scale, params):
        P_h = jnp.asarray(adaptive_pool_matrix(H, s))
        P_w = jnp.asarray(adaptive_pool_matrix(W, s))
        U_h = jnp.asarray(bilinear_upsample_matrix(H, s))
        U_w = jnp.asarray(bilinear_upsample_matrix(W, s))
        pooled = jnp.einsum('ah,nchw,bw->ncab', P_h, x, P_w)
        y = jnp.einsum('oc,ncab->noab', Wc, pooled)
        z = jnp.maximum(y * bn_scale[None, :, :, None]
                        + bn_shift[None, :, :, None], 0.0)
        up = jnp.einsum('ia,noab,jb->noij', U_h, z, U_w)
        outs.append(up)
    return jnp.concatenate(outs, axis=1)


# --------------------------------- main ------------------------------------ #

if __name__ == "__main__":
    key = jax.random.PRNGKey(0)
    k_x, k_p = jax.random.split(key)

    N, C_in, H, W = 2, 4, 16, 16
    C_out = 4
    out_scale = (1, 2, 3, 6)

    x = jax.random.normal(k_x, (N, C_in, H, W), jnp.float32)
    params = make_ppm_params(k_p, C_in, C_out, out_scale)

    out = ppm_forward(x, params, out_scale)
    jax.block_until_ready(out)

    expected_channels = C_in + len(out_scale) * C_out
    assert out.shape == (N, expected_channels, H, W), out.shape

    ref = ppm_reference(x, params, out_scale)
    np.testing.assert_allclose(np.asarray(out), np.asarray(ref),
                               rtol=1e-3, atol=1e-3)

    print("KERNEL_OK")
</pallas_src>

<mosaic_0001>
module attributes {stable_mosaic.version = 11 : i64} {
  func.func @ppm_fused_kernel(%arg0: i32, %arg1: memref<1x5x256xf32, #tpu.memory_space<vmem>>, %arg2: memref<256x50xf32, #tpu.memory_space<vmem>>, %arg3: memref<16x5xf32, #tpu.memory_space<vmem>>, %arg4: memref<16x50xf32, #tpu.memory_space<vmem>>, %arg5: memref<50x256xf32, #tpu.memory_space<vmem>>, %arg6: memref<1x20x256xf32, #tpu.memory_space<vmem>>) attributes {dimension_semantics = [#tpu.dimension_semantics<parallel>], iteration_bounds = array<i64: 2>, scalar_prefetch = 0 : i64, scratch_operands = 0 : i64, tpu.core_type = #tpu.core_type<tc>, window_params = [{transform_indices = @transform_0, window_bounds = array<i64: 1, 5, 256>}, {pipeline_mode = #tpu.pipeline_mode<synchronous>, transform_indices = @transform_1, window_bounds = array<i64: 256, 50>}, {pipeline_mode = #tpu.pipeline_mode<synchronous>, transform_indices = @transform_2, window_bounds = array<i64: 16, 5>}, {pipeline_mode = #tpu.pipeline_mode<synchronous>, transform_indices = @transform_3, window_bounds = array<i64: 16, 50>}, {pipeline_mode = #tpu.pipeline_mode<synchronous>, transform_indices = @transform_4, window_bounds = array<i64: 50, 256>}, {transform_indices = @transform_5, window_bounds = array<i64: 1, 20, 256>}]} {
    %c0 = arith.constant 0 : index
    %c0_0 = arith.constant 0 : index
    %c0_1 = arith.constant 0 : index
    %0 = vector.load %arg1[%c0, %c0_0, %c0_1] : memref<1x5x256xf32, #tpu.memory_space<vmem>>, vector<1x5x256xf32>
    %1 = vector.shape_cast %0 : vector<1x5x256xf32> to vector<5x256xf32>
    %c0_2 = arith.constant 0 : index
    %c0_3 = arith.constant 0 : index
    %2 = vector.load %arg2[%c0_2, %c0_3] : memref<256x50xf32, #tpu.memory_space<vmem>>, vector<256x50xf32>
    %cst = arith.constant dense<0.000000e+00> : vector<5x50xf32>
    %3 = tpu.matmul %1, %2, %cst {dimension_numbers = #tpu.dot_dimension_numbers<[1], [0], [0], [1], [0, 0, 1, 1], [], []>} : vector<5x256xf32>, vector<256x50xf32>, vector<5x50xf32> -> vector<5x50xf32>
    %c0_4 = arith.constant 0 : index
    %c0_5 = arith.constant 0 : index
    %4 = vector.load %arg3[%c0_4, %c0_5] : memref<16x5xf32, #tpu.memory_space<vmem>>, vector<16x5xf32>
    %cst_6 = arith.constant dense<0.000000e+00> : vector<16x50xf32>
    %5 = tpu.matmul %4, %3, %cst_6 {dimension_numbers = #tpu.dot_dimension_numbers<[1], [0], [0], [1], [0, 0, 1, 1], [], []>} : vector<16x5xf32>, vector<5x50xf32>, vector<16x50xf32> -> vector<16x50xf32>
    %cst_7 = arith.constant 0.000000e+00 : f32
    %6 = vector.broadcast %cst_7 : f32 to vector<16x50xf32>
    %7 = arith.maximumf %5, %6 : vector<16x50xf32>
    %c0_8 = arith.constant 0 : index
    %c0_9 = arith.constant 0 : index
    %8 = vector.load %arg4[%c0_8, %c0_9] : memref<16x50xf32, #tpu.memory_space<vmem>>, vector<16x50xf32>
    %9 = arith.mulf %7, %8 : vector<16x50xf32>
    %c0_10 = arith.constant 0 : index
    %c0_11 = arith.constant 0 : index
    %10 = vector.load %arg5[%c0_10, %c0_11] : memref<50x256xf32, #tpu.memory_space<vmem>>, vector<50x256xf32>
    %cst_12 = arith.constant dense<0.000000e+00> : vector<16x256xf32>
    %11 = tpu.matmul %9, %10, %cst_12 {dimension_numbers = #tpu.dot_dimension_numbers<[1], [0], [0], [1], [0, 0, 1, 1], [], []>} : vector<16x50xf32>, vector<50x256xf32>, vector<16x256xf32> -> vector<16x256xf32>
    %12 = vector.extract_strided_slice %1 {offsets = [0, 0], sizes = [4, 256], strides = [1, 1]} : vector<5x256xf32> to vector<4x256xf32>
    %c0_13 = arith.constant 0 : index
    %c0_14 = arith.constant 0 : index
    %c0_15 = arith.constant 0 : index
    %13 = vector.load %arg6[%c0_13, %c0_14, %c0_15] : memref<1x20x256xf32, #tpu.memory_space<vmem>>, vector<1x4x256xf32>
    %14 = vector.shape_cast %13 : vector<1x4x256xf32> to vector<4x256xf32>
    %15 = vector.shape_cast %12 : vector<4x256xf32> to vector<1x4x256xf32>
    tpu.vector_store %arg6[%c0_13, %c0_14, %c0_15], %15 {strides = array<i32>} : memref<1x20x256xf32, #tpu.memory_space<vmem>>, vector<1x4x256xf32>,
    %c0_16 = arith.constant 0 : index
    %c4 = arith.constant 4 : index
    %c0_17 = arith.constant 0 : index
    %16 = vector.load %arg6[%c0_16, %c4, %c0_17] : memref<1x20x256xf32, #tpu.memory_space<vmem>>, vector<1x16x256xf32>
    %17 = vector.shape_cast %16 : vector<1x16x256xf32> to vector<16x256xf32>
    %18 = vector.shape_cast %11 : vector<16x256xf32> to vector<1x16x256xf32>
    tpu.vector_store %arg6[%c0_16, %c4, %c0_17], %18 {strides = array<i32>} : memref<1x20x256xf32, #tpu.memory_space<vmem>>, vector<1x16x256xf32>,
    return
  }
  func.func @transform_0(%arg0: i32) -> (i32, i32, i32) {
    %c0_i32 = arith.constant 0 : i32
    %c0_i32_0 = arith.constant 0 : i32
    %c0_i32_1 = arith.constant 0 : i32
    return %arg0, %c0_i32, %c0_i32_0 : i32, i32, i32
  }
  func.func @transform_1(%arg0: i32) -> (i32, i32) {
    %c0_i32 = arith.constant 0 : i32
    %c0_i32_0 = arith.constant 0 : i32
    %c0_i32_1 = arith.constant 0 : i32
    return %c0_i32, %c0_i32_0 : i32, i32
  }
  func.func @transform_2(%arg0: i32) -> (i32, i32) {
    %c0_i32 = arith.constant 0 : i32
    %c0_i32_0 = arith.constant 0 : i32
    %c0_i32_1 = arith.constant 0 : i32
    return %c0_i32, %c0_i32_0 : i32, i32
  }
  func.func @transform_3(%arg0: i32) -> (i32, i32) {
    %c0_i32 = arith.constant 0 : i32
    %c0_i32_0 = arith.constant 0 : i32
    %c0_i32_1 = arith.constant 0 : i32
    return %c0_i32, %c0_i32_0 : i32, i32
  }
  func.func @transform_4(%arg0: i32) -> (i32, i32) {
    %c0_i32 = arith.constant 0 : i32
    %c0_i32_0 = arith.constant 0 : i32
    %c0_i32_1 = arith.constant 0 : i32
    return %c0_i32, %c0_i32_0 : i32, i32
  }
  func.func @transform_5(%arg0: i32) -> (i32, i32, i32) {
    %c0_i32 = arith.constant 0 : i32
    %c0_i32_0 = arith.constant 0 : i32
    %c0_i32_1 = arith.constant 0 : i32
    return %arg0, %c0_i32, %c0_i32_0 : i32, i32, i32
  }
}

</mosaic_0001>

<bundles_post_ra>
// kernel: tpu_custom_call.1
= control target key start
LH: loop header
LB: loop body
LE: loop exit
PB: predicated region body
PF: predicated region fallthrough
CT: control target
= control target key end

     0   :  { %s762_s18 = smov 0   ;;  %s941_s0 = inlined_call_operand.vmem [shape: f32[2,5,256], index: 0, kind: input, shape index: {}]   ;;  %s942_s1 = inlined_call_operand.vmem [shape: f32[256,50], index: 1, kind: input, shape index: {}]   ;;  %s943_s2 = inlined_call_operand.vmem [shape: f32[16,5], index: 2, kind: input, shape index: {}]   ;;  %s944_s3 = inlined_call_operand.vmem [shape: f32[16,50], index: 3, kind: input, shape index: {}]   ;;  %s945_s4 = inlined_call_operand.vmem [shape: f32[50,256], index: 4, kind: input, shape index: {}]   ;;  %s946_s5 = inlined_call_operand.vmem [shape: f32[2,20,256], index: 5, kind: output, shape index: {}]  }
   0x1 LB: > { %s608_s19 = sadd.s32 4294967295, %s729_s18   ;;  %p612_p0 = scmp.ge.s32.totalorder %s729_s18, 1  ;;  %s729_s18 = sphi %s762_s18, %s15_s18  }
   0x2   : > { %p187_p1 = scmp.lt.s32.totalorder %s729_s18, 3 }
   0x4   : > { %p188_p2 = pnand %p612_p0, %p187_p1 }
   0x5   : > { %v243_v0 = vld [vmem:[%s942_s1 + $0x80] sm:$0xff] (!%p188_p2)  ;;  %v244_v1 = vld [vmem:[%s942_s1 + $0x88] sm:$0xff] (!%p188_p2)  ;;  %p215_p3 = scmp.lt.s32.totalorder (!%p188_p2), %s608_s19, 1  ;;  %v245_v5 = vld [vmem:[%s942_s1 + $0x90] sm:$0xff] (!%p188_p2)  ;;  %vm331_vm0 = vcmask (!%p188_p2), 39936   ;;  %vm338_vm1 = vcmask (!%p188_p2), 1044480  }
   0x6   : > { %191 = sbr.rel (%p188_p2) target bundleno = 695 (0x2b7), region = 40  ;;  %v227_v2 = vld [vmem:[%s942_s1] sm:$0xff] (!%p188_p2)  ;;  %v669_v3 = vpack.c.bf16 (!%p188_p2), %v244_v1, %v243_v0  ;;  %v228_v4 = vld [vmem:[%s942_s1 + $0x8] sm:$0xff] (!%p188_p2)  ;;  %v246_v6 = vld [vmem:[%s942_s1 + $0x98] sm:$0xff] (!%p188_p2)  ;;  %vm444_vm2 = vcmask (!%p188_p2), 1041408   ;;  %vm437_vm3 = vcmask (!%p188_p2), 408576  }
   0x7   : > { %v671_v7 = vpack.c.bf16 (!%p188_p2), %v228_v4, %v227_v2  ;;  %v673_v8 = vpack.c.bf16 (!%p188_p2), %v246_v6, %v245_v5  ;;  %v229_v9 = vld [vmem:[%s942_s1 + $0x10] sm:$0xff] (!%p188_p2)  ;;  %v230_v10 = vld [vmem:[%s942_s1 + $0x18] sm:$0xff] (!%p188_p2)  ;;  %v247_v11 = vld [vmem:[%s942_s1 + $0xa0] sm:$0xff] (!%p188_p2)  ;;  %vm534_vm4 = vcmask (!%p188_p2), 1043456  }
   0x8   : > { %670 = vmatprep.subr.bf16.mxu0 (!%p188_p2), %v669_v3  ;;  %v248_v12 = vld [vmem:[%s942_s1 + $0xa8] sm:$0xff] (!%p188_p2)  ;;  %v675_v13 = vpack.c.bf16 (!%p188_p2), %v230_v10, %v229_v9  ;;  %v231_v15 = vld [vmem:[%s942_s1 + $0x20] sm:$0xff] (!%p188_p2)  ;;  %v249_v17 = vld [vmem:[%s942_s1 + $0xb0] sm:$0xff] (!%p188_p2) }
   0x9   : > { %672 = vmatpush3.bf16.msra.mxu0 (!%p188_p2), %v671_v7  ;;  %v677_v14 = vpack.c.bf16 (!%p188_p2), %v248_v12, %v247_v11  ;;  %v232_v16 = vld [vmem:[%s942_s1 + $0x28] sm:$0xff] (!%p188_p2)  ;;  %v250_v18 = vld [vmem:[%s942_s1 + $0xb8] sm:$0xff] (!%p188_p2)  ;;  %v233_v21 = vld [vmem:[%s942_s1 + $0x30] sm:$0xff] (!%p188_p2)  ;;  %v731_v11 = vmov (!%p188_p2), 0.0  }
   0xa   : > { %674 = vmatprep.subr.bf16.mxu0 (!%p188_p2), %v673_v8  ;;  %v679_v19 = vpack.c.bf16 (!%p188_p2), %v232_v16, %v231_v15  ;;  %v681_v20 = vpack.c.bf16 (!%p188_p2), %v250_v18, %v249_v17  ;;  %v234_v22 = vld [vmem:[%s942_s1 + $0x38] sm:$0xff] (!%p188_p2)  ;;  %v251_v23 = vld [vmem:[%s942_s1 + $0xc0] sm:$0xff] (!%p188_p2)  ;;  %v252_v24 = vld [vmem:[%s942_s1 + $0xc8] sm:$0xff] (!%p188_p2) }
   0xb   : > { %v683_v27 = vpack.c.bf16 (!%p188_p2), %v234_v22, %v233_v21  ;;  %v685_v28 = vpack.c.bf16 (!%p188_p2), %v252_v24, %v251_v23  ;;  %v235_v29 = vld [vmem:[%s942_s1 + $0x40] sm:$0xff] (!%p188_p2)  ;;  %v236_v30 = vld [vmem:[%s942_s1 + $0x48] sm:$0xff] (!%p188_p2)  ;;  %v253_v31 = vld [vmem:[%s942_s1 + $0xd0] sm:$0xff] (!%p188_p2) }
   0xc   : > { %v254_v32 = vld [vmem:[%s942_s1 + $0xd8] sm:$0xff] (!%p188_p2)  ;;  %v687_v33 = vpack.c.bf16 (!%p188_p2), %v236_v30, %v235_v29  ;;  %v237_v35 = vld [vmem:[%s942_s1 + $0x50] sm:$0xff] (!%p188_p2)  ;;  %v255_v37 = vld [vmem:[%s942_s1 + $0xe0] sm:$0xff] (!%p188_p2) }
   0xd   : > { %s948_s19 = smov (!%p215_p3, %s608_s19), 1  ;;  %676 = vmatpush3.bf16.msra.mxu0 %v675_v13  ;;  %v689_v34 = vpack.c.bf16 %v254_v32, %v253_v31  ;;  %v238_v36 = vld [vmem:[%s942_s1 + $0x58] sm:$0xff]  ;;  %v256_v38 = vld [vmem:[%s942_s1 + $0xe8] sm:$0xff]  ;;  %v239_v41 = vld [vmem:[%s942_s1 + $0x60] sm:$0xff] }
   0xe   : > { %s625_s15 = sshll.u32 %s948_s19, 4  ;;  %s713_s26 = smul.u32 48, %s948_s19  ;;  %678 = vmatprep.subr.bf16.mxu0 %v677_v14  ;;  %v691_v39 = vpack.c.bf16 %v238_v36, %v237_v35  ;;  %v693_v40 = vpack.c.bf16 %v256_v38, %v255_v37  ;;  %v240_v42 = vld [vmem:[%s942_s1 + $0x68] sm:$0xff]  ;;  %v257_v43 = vld [vmem:[%s942_s1 + $0xf0] sm:$0xff]  ;;  %v258_v44 = vld [vmem:[%s942_s1 + $0xf8] sm:$0xff] }
   0xf   : > { %s219_s29 = scalar_lea.vmem %s941_s0, %s625_s15  ;;  %v695_v45 = vpack.c.bf16 %v240_v42, %v239_v41  ;;  %v697_v46 = vpack.c.bf16 %v258_v44, %v257_v43  ;;  %v241_v47 = vld [vmem:[%s942_s1 + $0x70] sm:$0xff]  ;;  %v242_v48 = vld [vmem:[%s942_s1 + $0x78] sm:$0xff]  ;;  %v329_v50 = vld [vmem:[%s943_s2] sm:$0xff] }
  0x10   : > { %s830_s14 = scalar_lea.vmem %s946_s5, %s713_s26  ;;  %v226_v25 = vld [vmem:[%s219_s29 + $0x8] sm:$0x1f]  ;;  %v225_v26 = vld [vmem:[%s219_s29] sm:$0x1f]  ;;  %v699_v49 = vpack.c.bf16 %v242_v48, %v241_v47  ;;  %666 = vmatprep.mubr.msk.f32.mxu1 %vm331_vm0, %v329_v50  ;;  %v426_v52 = vld [vmem:[%s945_s4 + $0x18] sm:$0xff] }
  0x11   : > { %323 = vmatprep.mubr.f32.mxu0 %v226_v25  ;;  %529 = vst [vmem:[%s830_s14 + $0x8] sm:$0xf] %v226_v25  ;;  %680 = vmatpush3.bf16.msra.mxu0 %v679_v19  ;;  %528 = vst [vmem:[%s830_s14] sm:$0xf] %v225_v26  ;;  %v424_v51 = vld [vmem:[%s945_s4 + $0x8] sm:$0xff]  ;;  %v423_v54 = vld [vmem:[%s945_s4] sm:$0xff] }
  0x12   : > { %682 = vmatprep.subr.bf16.mxu0 %v681_v20  ;;  %v425_v55 = vld [vmem:[%s945_s4 + $0x10] sm:$0xff]  ;;  %v428_v57 = vld [vmem:[%s945_s4 + $0x28] sm:$0xff]  ;;  %v430_v58 = vld [vmem:[%s945_s4 + $0x38] sm:$0xff]  ;;  %v701_v60 = vpack.c.bf16 %v426_v52, %v424_v51 }
  0x13   : > { %v330_v61 = vld [vmem:[%s943_s2 + $0x8] sm:$0xff]  ;;  %v703_v62 = vpack.c.bf16 %v425_v55, %v423_v54  ;;  %v705_v63 = vpack.c.bf16 %v430_v58, %v428_v57  ;;  %v427_v0 = vld [vmem:[%s945_s4 + $0x20] sm:$0xff]  ;;  %v429_v1 = vld [vmem:[%s945_s4 + $0x30] sm:$0xff] }
  0x14   : > { %v707_v2 = vpack.c.bf16 %v429_v1, %v427_v0  ;;  %v432_v3 = vld [vmem:[%s945_s4 + $0x48] sm:$0xff]  ;;  %v434_v4 = vld [vmem:[%s945_s4 + $0x58] sm:$0xff]  ;;  %v431_v6 = vld [vmem:[%s945_s4 + $0x40] sm:$0xff] }
  0x15   : > { %684 = vmatpush3.bf16.msra.mxu0 %v683_v27  ;;  %v709_v5 = vpack.c.bf16 %v434_v4, %v432_v3  ;;  %v433_v7 = vld [vmem:[%s945_s4 + $0x50] sm:$0xff]  ;;  %v436_v9 = vld [vmem:[%s945_s4 + $0x68] sm:$0x3]  ;;  %v435_v10 = vld [vmem:[%s945_s4 + $0x60] sm:$0x3] }
  0x16   : > { %686 = vmatprep.subr.bf16.mxu0 %v685_v28  ;;  %v711_v8 = vpack.c.bf16 %v433_v7, %v431_v6  ;;  %v419_v14 = vld [vmem:[%s944_s3] sm:$0xff]  ;;  %v420_v18 = vld [vmem:[%s944_s3 + $0x8] sm:$0xff] }
  0x19   : > { %688 = vmatpush3.bf16.msra.mxu0 %v687_v33 }
  0x1a   : > { %690 = vmatprep.subr.bf16.mxu0 %v689_v34 }
  0x1d   : > { %692 = vmatpush3.bf16.msra.mxu0 %v691_v39 }
  0x1e   : > { %694 = vmatprep.subr.bf16.mxu0 %v693_v40 }
  0x21   : > { %696 = vmatpush3.bf16.msra.mxu0 %v695_v45 }
  0x22   : > { %698 = vmatprep.subr.bf16.mxu0 %v697_v46 }
  0x25   : > { %700 = vmatpush3.bf16.msra.mxu0 %v699_v49 }
  0x28   : > { %324 = vmatmul.mubr.f32.vlgmr.msra.gmra.mrb[0].mxu0 %v225_v26 }
  0xfb   : > { %v658_v53 = vpop.f32.mrb[0].mxu0 }
  0xfc   : > { %v659_v56 = vpop.f32.mrb[1].mxu0 }
  0xfd   : > { %v660_v59 = vadd.f32 %v659_v56, %v658_v53 }
  0xff   : > { %664 = vmatprep.subr.msk.mxu1 %vm338_vm1, %v660_v59 }
 0x100   : > { %665 = vmatpush3.msk.msra.mxu1 %vm338_vm1, %v660_v59 }
 0x101   : > { %667 = vmatmul.mubr.msk.f32.vlgmr.msra.gmra.mrb[0].mxu1 %vm331_vm0, %v330_v61  ;;  %702 = vmatprep.subr.bf16.mxu1 %v701_v60 }
 0x102   : > { %704 = vmatpush1.bf16.msra.mxu1 %v703_v62  ;;  %515 = vmatprep.mubr.f32.mxu1 %v731_v11 }
 0x103   : > { %706 = vmatprep.subr.bf16.mxu1 %v705_v63 }
 0x106   : > { %708 = vmatpush1.bf16.msra.mxu1 %v707_v2 }
 0x107   : > { %710 = vmatprep.subr.bf16.mxu1 %v709_v5 }
 0x10a   : > { %712 = vmatpush1.bf16.msra.mxu1 %v711_v8 }
 0x10b   : > { %619 = vmatprep.subr.msk.mxu1 %vm444_vm2, %v436_v9 }
 0x10e   : > { %620 = vmatpush1.msk.msra.mxu1 %vm444_vm2, %v435_v10 }
 0x1d4   : > { %v668_v12 = vpop.f32.mrb[0].mxu1 }
 0x1d5   : > { %v408_v13 = vpop.f32.mrb[1].mxu1  ;;  %v418_v16 = vmax.f32 %v668_v12, 0.0 }
 0x1d6   : > { %v417_v15 = vmax.f32 %v408_v13, 0.0 }
 0x1d7   : > { %v422_v19 = vmul.f32 %v420_v18, %v418_v16 }
 0x1d8   : > { %v421_v17 = vmul.f32 %v419_v14, %v417_v15 }
 0x1da   : > { %621 = vmatmul.mubr.msk.f32.vlgmr.msra.gmra.mrb[2].mxu1 %vm437_vm3, %v421_v17 }
 0x1db   : > { %521 = vmatprep.mubr.f32.mxu1 %v731_v11 }
 0x1de   : > { %622 = vmatmul.mubr.msk.f32.gmra.mrb[4].mxu1 %vm437_vm3, %v422_v19 }
 0x2ad   : > { %v517_v20 = vpop.f32.mrb[2].mxu1 }
 0x2ae   : > { %v535_v21 = vrot.slane %v517_v20, 4  ;;  %v519_v22 = vpop.f32.mrb[3].mxu1 }
 0x2af   : > { %v536_v23 = vrot.slane %v519_v22, 4 }
 0x2b0   : > { %547 = vst [vmem:[%s830_s14] sm:$0xf0] %v535_v21 }
 0x2b1   : > { %548 = vst [vmem:[%s830_s14 + $0x8] sm:$0xf0] %v536_v23  ;;  %v523_v24 = vpop.f32.mrb[4].mxu1 }
 0x2b2   : > { %v537_v25 = vrot.slane %v523_v24, 4  ;;  %v525_v26 = vpop.f32.mrb[5].mxu1 }
 0x2b3   : > { %v539_v27 = vrot.slane %v525_v26, 4 }
 0x2b4   : > { %v538_v28 = vsel %vm534_vm4, %v535_v21, %v537_v25  ;;  %551 = vst [vmem:[%s830_s14 + $0x20] sm:$0xf] %v537_v25 }
 0x2b5   : > { %549 = vst [vmem:[%s830_s14 + $0x10] sm:$0xff] %v538_v28  ;;  %v540_v29 = vsel %vm534_vm4, %v536_v23, %v539_v27  ;;  %552 = vst [vmem:[%s830_s14 + $0x28] sm:$0xf] %v539_v27 }
 0x2b6   : > { %550 = vst [vmem:[%s830_s14 + $0x18] sm:$0xff] %v540_v29 }
 0x2b7 PF: > { %s15_s18 = sadd.s32 1, %s729_s18  }
 0x2b8   : > { %p12_p4 = scmp.ge.s32.totalorder %s15_s18, 4  }
 0x2ba   :  { %14 = sbr.rel (!%p12_p4) target bundleno = 1 (0x1), region = 70 }

</bundles_post_ra>
